<compile_context>
chip_gen: v7x
topology: tpu7x:2x2x1
jax: 0.10.0
libtpu: 0.0.40
codegen_flags: <defaults>
</compile_context>

<pallas_src>
import jax
import jax.numpy as jnp
from jax.experimental import pallas as pl
from jax.experimental.pallas import tpu as pltpu


_LANE = 128                               # lane width / tiling granule
_TARGET_BLOCK_BYTES = 2 * 1024 * 1024     # safe on v5e/v6e/v7x scoped VMEM
_TARGET_GRID_STEPS = 16                   # enough steps for 2 TCs on v7x
_MIN_BLOCK_BYTES = 256 * 1024             # don't split below this (per-step overhead)


def _transpose2d_kernel(x_ref, o_ref):
    # x_ref: (tp, tq) tile, o_ref: (tq, tp) tile.
    # Single full-tile 2-D transpose -> one XLU relayout pass per tile.
    o_ref[...] = x_ref[...].T


def _round_up(v, m):
    return ((v + m - 1) // m) * m


def _cdiv(a, b):
    return -(-a // b)


def _fit_tile(dim, cap):
    """Largest tile extent <= cap that is either the full dim or a 128-multiple."""
    if dim <= cap:
        return dim
    return max(_LANE, (cap // _LANE) * _LANE)


def _halve_tile(t):
    """Roughly halve a tile extent, staying a 128-multiple (>= 128)."""
    return max(_LANE, _round_up(_cdiv(t, 2), _LANE))


def _chip_tuning():
    """Per-generation block budget. Defensive: the default is safe everywhere."""
    block_bytes = _TARGET_BLOCK_BYTES
    vmem_limit = None
    try:
        info = pltpu.get_tpu_info()
        if getattr(info, "vmem_capacity_bytes", 0) >= 96 * 1024 * 1024:
            # v5e/v6e (128 MiB physical VMEM): larger blocks amortize the
            # ~0.35us/step overhead; in+out double-buffered = 16 MiB, so set
            # an explicit 32 MiB scoped limit (v5e default is only 16 MiB).
            block_bytes = 4 * 1024 * 1024
            vmem_limit = 32 * 1024 * 1024
    except Exception:
        pass
    return block_bytes, vmem_limit


def _choose_tiles(b, p, q, itemsize, total_bytes, block_bytes):
    """Pick (tp, tq) for the (B, P, Q) -> (B, Q, P) transpose.

    tp is the *output* minor (lane) dim -> kept wide for unmasked stores.
    tq is the *input* minor dim -> kept wide for long contiguous HBM reads.
    Tile extents are either the full dim or 128-multiples (valid lane AND
    sublane granularity for f32/bf16/int8 on all TPU generations).
    """
    budget = max(block_bytes // itemsize, _LANE * _LANE)

    if p * q <= budget:
        tp, tq = p, q
    else:
        # Balance the two extents (~sqrt(budget) each) within the byte budget.
        side = max(_LANE, (int(budget ** 0.5) // _LANE) * _LANE)
        tp = _fit_tile(p, side)
        tq = _fit_tile(q, max(budget // tp, _LANE))
        tp = _fit_tile(p, max(budget // tq, _LANE))   # re-grow P if Q was small

    # Pipeline-depth booster: ensure enough grid steps for the double-buffered
    # DMA pipeline to hide HBM latency (and, on v7x, for both TensorCores to
    # have work).  Split whichever axis currently has the larger tile, so the
    # NHWC->NCHW case (huge P, tiny Q) gets split along P too.  The target is
    # capped by a minimum block size so tiny tensors don't pay per-step
    # overhead for depth they can't use.
    target = min(_TARGET_GRID_STEPS, max(2, total_bytes // _MIN_BLOCK_BYTES))
    while b * _cdiv(p, tp) * _cdiv(q, tq) < target:
        if tq >= tp and tq > _LANE:
            tq = _halve_tile(tq)
        elif tp > _LANE:
            tp = _halve_tile(tp)
        elif tq > _LANE:
            tq = _halve_tile(tq)
        else:
            break
    return tp, tq


def _make_index_map(pos, first, second):
    """Index map over a reordered 3-D grid; emits (batch, first, second) blocks."""
    def index_map(g0, g1, g2):
        g = (g0, g1, g2)
        return g[pos["b"]], g[pos[first]], g[pos[second]]
    return index_map


def _batched_transpose_pallas(x3):
    """(B, P, Q) -> (B, Q, P) via a tiled Pallas transpose kernel."""
    b, p, q = x3.shape
    itemsize = jnp.dtype(x3.dtype).itemsize
    total_bytes = b * p * q * itemsize
    block_bytes, vmem_limit = _chip_tuning()
    tp, tq = _choose_tiles(b, p, q, itemsize, total_bytes, block_bytes)
    n_p, n_q = _cdiv(p, tp), _cdiv(q, tq)

    # Put the grid axis with the most blocks first: with all-parallel
    # semantics this gives the best 2-TensorCore load balance on v7x
    # (near-zero effect on single-TC v5e/v6e).
    counts = {"b": b, "q": n_q, "p": n_p}
    order = sorted(("b", "q", "p"), key=lambda a: -counts[a])
    grid = tuple(counts[a] for a in order)
    pos = {a: i for i, a in enumerate(order)}

    # Input block keeps the contiguous minor dim (Q) wide per tile; output
    # block is lane-dense in P.  Partial edge tiles are masked by Pallas.
    in_spec = pl.BlockSpec((None, tp, tq), _make_index_map(pos, "p", "q"))
    out_spec = pl.BlockSpec((None, tq, tp), _make_index_map(pos, "q", "p"))

    cp_kwargs = dict(dimension_semantics=("parallel", "parallel", "parallel"))
    if vmem_limit is not None:
        cp_kwargs["vmem_limit_bytes"] = vmem_limit

    return pl.pallas_call(
        _transpose2d_kernel,
        out_shape=jax.ShapeDtypeStruct((b, q, p), x3.dtype),
        grid=grid,
        in_specs=[in_spec],
        out_specs=out_spec,
        # Purely mem-bound: tell XLA's scheduler so surrounding ops overlap.
        cost_estimate=pl.CostEstimate(
            flops=0, transcendentals=0, bytes_accessed=2 * total_bytes),
        compiler_params=pltpu.CompilerParams(**cp_kwargs),
    )(x3)


def _merge_axis_groups(dims):
    """Merge input axes that stay contiguous & in-order through the permutation.

    Returns (in_groups, merged_perm): `in_groups` partitions the input axes in
    input order; `merged_perm[i]` is the input-group index at output position i.
    """
    out_groups = []
    cur = [dims[0]]
    for d in dims[1:]:
        if d == cur[-1] + 1:
            cur.append(d)
        else:
            out_groups.append(cur)
            cur = [d]
    out_groups.append(cur)
    in_groups = sorted(out_groups, key=lambda g: g[0])
    merged_perm = [in_groups.index(g) for g in out_groups]
    return in_groups, merged_perm


def _permute_core(x, dims):
    """Permute (no identity, no size-1 axes); returns array of permuted shape."""
    in_groups, merged_perm = _merge_axis_groups(dims)
    k = len(in_groups)
    perm_shape = tuple(x.shape[d] for d in dims)
    # Form handled by the kernel: identity prefix + swap of the last two groups.
    handled = k >= 2 and merged_perm == list(range(k - 2)) + [k - 1, k - 2]
    if not handled:
        # TODO(synk): merged permutations that are not a batched two-group swap
        # (e.g. (0, 2, 1, 3) with no singleton dims) fall back to XLA transpose.
        return jnp.transpose(x, dims)

    def _prod(axes):
        r = 1
        for a in axes:
            r *= x.shape[a]
        return r

    batch = 1
    for g in in_groups[: k - 2]:
        batch *= _prod(g)
    p_dim = _prod(in_groups[k - 2])
    q_dim = _prod(in_groups[k - 1])

    # Row-major group collapse: pure metadata reshape, no data movement.
    x3 = jnp.reshape(x, (batch, p_dim, q_dim))
    y3 = _batched_transpose_pallas(x3)            # (batch, q_dim, p_dim)
    return jnp.reshape(y3, perm_shape)


def permute_pallas(x: jax.Array, dims) -> jax.Array:
    """torch.permute(x, dims) implemented with a Pallas TPU kernel."""
    ndim = x.ndim
    if ndim:
        dims = tuple(int(d) % ndim for d in dims)
    else:
        dims = tuple(int(d) for d in dims)
    assert sorted(dims) == list(range(ndim)), "dims must be a permutation"
    out_shape = tuple(x.shape[d] for d in dims)

    if ndim <= 1 or dims == tuple(range(ndim)):
        return x                       # identity permutation (pure view in torch)
    if x.size == 0:
        return jnp.transpose(x, dims)  # degenerate empty tensor

    # Squeeze size-1 axes first (metadata-only): they block group merging and
    # can force tiles whose output minor dim is 1 (fully masked stores).  Many
    # singleton-involving permutes become pure reshapes this way.
    keep = tuple(i for i in range(ndim) if x.shape[i] != 1)
    if len(keep) != ndim:
        remap = {old: new for new, old in enumerate(keep)}
        x_sq = jnp.reshape(x, tuple(x.shape[i] for i in keep))
        sq_dims = tuple(remap[d] for d in dims if d in remap)
        if len(sq_dims) <= 1 or sq_dims == tuple(range(len(sq_dims))):
            return jnp.reshape(x_sq, out_shape)   # permute is a pure reshape
        y_sq = _permute_core(x_sq, sq_dims)
        return jnp.reshape(y_sq, out_shape)

    return jnp.reshape(_permute_core(x, dims), out_shape)


class Permute:
    """JAX/Pallas equivalent of the PyTorch `Permute` nn.Module."""

    def __init__(self, dims):
        self.dims = tuple(int(d) for d in dims)
        # Parameter-free module; nothing to initialize.

    def __call__(self, x: jax.Array) -> jax.Array:
        return permute_pallas(x, self.dims)


if __name__ == "__main__":
    key = jax.random.PRNGKey(0)
    # Small NCHW input consistent with ConvNeXt usage: batch=2, C=4, H=W=16.
    x = jax.random.normal(key, (2, 4, 16, 16), dtype=jnp.float32)

    # ConvNeXt uses Permute([0, 2, 3, 1]) (NCHW -> NHWC).
    module = Permute([0, 2, 3, 1])
    out = jax.block_until_ready(module(x))
    ref = jnp.transpose(x, (0, 2, 3, 1))
    assert out.shape == ref.shape, (out.shape, ref.shape)
    assert out.dtype == ref.dtype, (out.dtype, ref.dtype)
    assert bool(jnp.array_equal(out, ref)), "Pallas permute mismatch vs reference"

    # Inverse ConvNeXt permute (NHWC -> NCHW) — exercises the P-axis split path.
    module_inv = Permute([0, 3, 1, 2])
    back = jax.block_until_ready(module_inv(out))
    assert bool(jnp.array_equal(back, x)), "Pallas inverse-permute mismatch"

    # Plain batched 2-D transpose with a non-128-multiple middle dim.
    x3 = jax.random.normal(key, (2, 96, 128), dtype=jnp.float32)
    y3 = jax.block_until_ready(Permute([0, 2, 1])(x3))
    assert bool(jnp.array_equal(y3, jnp.transpose(x3, (0, 2, 1))))

    # Singleton-axis squeeze path: becomes a pure metadata reshape.
    x4 = jax.random.normal(key, (1, 4, 16, 16), dtype=jnp.float32)
    y4 = jax.block_until_ready(Permute([0, 2, 3, 1])(x4))
    assert bool(jnp.array_equal(y4, jnp.transpose(x4, (0, 2, 3, 1))))

    print("KERNEL_OK")
</pallas_src>

<mosaic_0001>
module attributes {stable_mosaic.version = 11 : i64} {
  func.func @_transpose2d_kernel(%arg0: i32, %arg1: i32, %arg2: i32, %arg3: memref<1x4x256xf32, #tpu.memory_space<vmem>>, %arg4: memref<1x256x4xf32, #tpu.memory_space<vmem>>) attributes {dimension_semantics = [#tpu.dimension_semantics<parallel>, #tpu.dimension_semantics<parallel>, #tpu.dimension_semantics<parallel>], iteration_bounds = array<i64: 2, 1, 1>, scalar_prefetch = 0 : i64, scratch_operands = 0 : i64, tpu.core_type = #tpu.core_type<tc>, window_params = [{transform_indices = @transform_0, window_bounds = array<i64: 1, 4, 256>}, {transform_indices = @transform_1, window_bounds = array<i64: 1, 256, 4>}]} {
    %c0 = arith.constant 0 : index
    %c0_0 = arith.constant 0 : index
    %c0_1 = arith.constant 0 : index
    %0 = vector.load %arg3[%c0, %c0_0, %c0_1] : memref<1x4x256xf32, #tpu.memory_space<vmem>>, vector<1x4x256xf32>
    %1 = vector.shape_cast %0 : vector<1x4x256xf32> to vector<4x256xf32>
    %2 = tpu.transpose %1, [1, 0] : vector<4x256xf32> -> vector<256x4xf32>
    %c0_2 = arith.constant 0 : index
    %c0_3 = arith.constant 0 : index
    %c0_4 = arith.constant 0 : index
    %3 = vector.load %arg4[%c0_2, %c0_3, %c0_4] : memref<1x256x4xf32, #tpu.memory_space<vmem>>, vector<1x256x4xf32>
    %4 = vector.shape_cast %3 : vector<1x256x4xf32> to vector<256x4xf32>
    %5 = vector.shape_cast %2 : vector<256x4xf32> to vector<1x256x4xf32>
    tpu.vector_store %arg4[%c0_2, %c0_3, %c0_4], %5 {strides = array<i32>} : memref<1x256x4xf32, #tpu.memory_space<vmem>>, vector<1x256x4xf32>,
    return
  }
  func.func @transform_0(%arg0: i32, %arg1: i32, %arg2: i32) -> (i32, i32, i32) {
    %c0_i32 = arith.constant 0 : i32
    return %arg0, %arg2, %arg1 : i32, i32, i32
  }
  func.func @transform_1(%arg0: i32, %arg1: i32, %arg2: i32) -> (i32, i32, i32) {
    %c0_i32 = arith.constant 0 : i32
    return %arg0, %arg1, %arg2 : i32, i32, i32
  }
}

</mosaic_0001>

<bundles_post_ra>
// kernel: tpu_custom_call.1
= control target key start
LH: loop header
LB: loop body
LE: loop exit
PB: predicated region body
PF: predicated region fallthrough
CT: control target
= control target key end

     0   :  { %6 = vsyncpa [#allocation3], 0  ;;  %s749_s0 = inlined_call_operand.hbm [shape: f32[2,4,256], index: 0, kind: input, shape index: {}]   ;;  %s750_s1 = inlined_call_operand.vmem [shape: f32[2,256,4], index: 1, kind: output, shape index: {}]  }
   0x1   :  { %8 = vsyncpa [#allocation3 + $0x1], 0  ;;  %s558_s6 = smov 0   ;;  %s560_s7 = smov 0  }
   0x2   :  { %s562_s8 = smov 0   ;;  %s564_s9 = smov 0  }
   0x3   :  { %s566_s10 = smov 0   ;;  %s568_s11 = smov 0  }
   0x4 LB: > { %s393_s12 = sadd.s32 4294967295, %s545_s11   ;;  %s33_s13 = sadd.s32 1, %s541_s10  ;;  %s545_s11 = sphi %s568_s11, %s14_s11   ;;  %s541_s10 = sphi %s566_s10, %s760_s10   ;;  %s537_s9 = sphi %s564_s9, %s759_s9   ;;  %s533_s8 = sphi %s562_s8, %s758_s8   ;;  %s529_s7 = sphi %s560_s7, %s757_s7   ;;  %s525_s6 = sphi %s558_s6, %s756_s6  }
   0x5   : > { %p35_p0 = scmp.ge.s32.totalorder %s33_s13, 2  ;;  %s44_s14 = sadd.s32 1, %s533_s8 }
   0x6   : > { %p51_p1 = scmp.ne.s32.totalorder %s533_s8, %s529_s7  ;;  %p52_p2 = scmp.eq.s32.totalorder %s545_s11, 0 }
   0x7   : > { %s762_s13 = smov (%p35_p0, %s33_s13), 0  ;;  %p57_p4 = scmp.ne.s32.totalorder %s529_s7, %s525_s6 }
   0x8   : > { %p594_p3 = por %p52_p2, %p51_p1  ;;  %s37_s16 = ssub.s32 %s541_s10, %s762_s13 }
   0x9   : > { %p58_p5 = scmp.eq.s32.totalorder %s393_s12, 0  ;;  %p42_p6 = scmp.eq.s32.totalorder %s37_s16, 0 }
   0xa   : > { %p414_p8 = scmp.lt.s32.totalorder %s545_s11, 2  ;;  %s111_s19 = sand.u32 1, %s533_s8  }
   0xb   : > { %p601_p7 = por %p58_p5, %p57_p4  ;;  %s406_s20 = sshll.u32 %s541_s10, 7 }
   0xc   : > { %s607_s18 = scalar_select %p42_p6, %s533_s8, %s44_s14  }
   0xd   : > { %s397_s21 = sshll.u32 %s111_s19, 3  ;;  %s614_s24 = scalar_lea.hbm %s749_s0, %s406_s20 }
   0xe   : > { %s115_s25 = scalar_lea.vmem [#allocation2], %s397_s21  ;;  %p618_p9 = pnand %p414_p8, %p594_p3 }
   0xf   : > { %s127_s26 = sshll.u32 %s115_s25, 4  ;;  %s112_s28 = scalar_lea.sflag [#allocation3], %s111_s19  ;;  %s622_s26 = int_to_ptr.vmem [resolvable:$true] %s127_s26 }
  0x10   : > { %s465_s29 = scalar_lea.hbm %s614_s24, 128  ;;  %p467_p13 = pneg %p618_p9 }
  0x11   : > { %p466_p12 = scmp.ne.s32.totalorder %s614_s24, %s465_s29  ;;  %s470_s3 = scalar_lea.hbm %s749_s0, 256 }
  0x12   : > { %p471_p2 = scmp.lt.u32.totalorder %s614_s24, %s749_s0  ;;  %p472_p3 = scmp.lt.u32.totalorder %s470_s3, %s465_s29 }
  0x13   : > { %p468_p0 = pnand %p467_p13, %p466_p12  ;;  %p474_p5 = scmp.lt.u32.totalorder %s465_s29, %s614_s24 }
  0x14   : > { %p473_p4 = por %p472_p3, %p471_p2 }
  0x15   : > { %p469_p1 = pneg %p468_p0 }
  0x16   : > { %p475_p6 = por %p474_p5, %p473_p4 }
  0x18   : > { %p476_p8 = pnand %p475_p6, %p469_p1 }
  0x1a   : > { %479 = shalt.err (!%p476_p8)
}
  0x1b   : > { %s480_s6 = scalar_lea.vmem %s622_s26, 128  ;;  %s547_s12 = smov [#allocation2]  }
  0x1c   : > { %p481_p12 = scmp.ne.s32.totalorder %s622_s26, %s480_s6  ;;  %s485_s14 = sshll.u32 %s547_s12, 4  ;;  %s486_s14 = int_to_ptr.vmem [resolvable:$false] %s485_s14 }
  0x1d   : > { %s487_s15 = scalar_lea.vmem %s486_s14, 256  ;;  %p488_p11 = scmp.lt.s32.totalorder %s622_s26, %s486_s14 }
  0x1e   : > { %p483_p0 = pnand %p481_p12, %p467_p13  ;;  %p489_p2 = scmp.lt.s32.totalorder %s487_s15, %s480_s6 }
  0x20   : > { %p484_p10 = pneg %p483_p0  ;;  %p490_p3 = por %p489_p2, %p488_p11 }
  0x22   : > { %p491_p4 = pnand %p490_p3, %p484_p10 }
  0x24   : > { %494 = shalt.err (!%p491_p4)
}
  0x25   : > { %413 = dma.hbm_to_vmem [thread:$0]  (!%p618_p9), %s614_s24, 128, %s622_s26, %s112_s28  }
  0x26   : > { %p754_p1 = scmp.lt.s32.totalorder %s545_s11, 3  ;;  %p755_p5 = scmp.ge.s32.totalorder %s545_s11, 1 }
  0x28   : > { %p133_p13 = pnand %p755_p5, %p754_p1 }
  0x29   : > { %s138_s16 = sand.u32 (!%p133_p13), 1, %s529_s7  }
  0x2a   : > { %136 = sbr.rel (%p133_p13) target bundleno = 305 (0x131), region = 24  ;;  %s401_s19 = sshll.u32 (!%p133_p13), %s138_s16, 3 }
  0x2b   : > { %s139_s20 = scalar_lea.sflag (!%p133_p13), [#allocation3], %s138_s16  ;;  %s142_s21 = scalar_lea.vmem (!%p133_p13), [#allocation2], %s401_s19 }
  0x31   : > { %520 = dma.done.wait (%p601_p7), %s139_s20, 128  }
  0x32   : > { %522 = vsyncadd (%p601_p7), %s139_s20, 4294967168  ;;  %v182_v0 = vld [vmem:[%s142_s21] sm:$0xff]  ;;  %p170_p9 = scmp.lt.s32.totalorder %s537_s9, 1  ;;  %vm250_vm0 = vcmask 31744  }
  0x33   : > { %186 = vxpose.xlu0.b32.start.end [1/1] (short) %v182_v0, 128  ;;  %v184_v1 = vcombine.high %v182_v0, %v182_v0 }
  0x34   : > { %s764_s9 = smov (!%p170_p9, %s537_s9), 1 }
  0x35   : > { %s407_s22 = sshll.u32 %s764_s9, 8 }
  0x36   : > { %s665_s25 = scalar_lea.vmem %s750_s1, %s407_s22 }
  0x70   : > { %218 = vxpose.xlu0.b32.start.end [1/1] (short) %v184_v1, 128 }
  0xb3   : > { %v202_v2 = vpop.trf.xlu0 }
  0xb4   : > { %251 = vst.msk [vmem:[%s665_s25] sm:$0xff] %vm250_vm0, %v202_v2 }
  0xb7   : > { %v203_v3 = vpop.trf.xlu0 }
  0xb8   : > { %252 = vst.msk [vmem:[%s665_s25 + $0x8] sm:$0xff] %vm250_vm0, %v203_v3 }
  0xbb   : > { %v204_v4 = vpop.trf.xlu0 }
  0xbc   : > { %253 = vst.msk [vmem:[%s665_s25 + $0x10] sm:$0xff] %vm250_vm0, %v204_v4 }
  0xbf   : > { %v205_v5 = vpop.trf.xlu0 }
  0xc0   : > { %254 = vst.msk [vmem:[%s665_s25 + $0x18] sm:$0xff] %vm250_vm0, %v205_v5 }
  0xc3   : > { %v206_v6 = vpop.trf.xlu0 }
  0xc4   : > { %255 = vst.msk [vmem:[%s665_s25 + $0x20] sm:$0xff] %vm250_vm0, %v206_v6 }
  0xc7   : > { %v207_v7 = vpop.trf.xlu0 }
  0xc8   : > { %256 = vst.msk [vmem:[%s665_s25 + $0x28] sm:$0xff] %vm250_vm0, %v207_v7 }
  0xcb   : > { %v208_v8 = vpop.trf.xlu0 }
  0xcc   : > { %257 = vst.msk [vmem:[%s665_s25 + $0x30] sm:$0xff] %vm250_vm0, %v208_v8 }
  0xcf   : > { %v209_v9 = vpop.trf.xlu0 }
  0xd0   : > { %258 = vst.msk [vmem:[%s665_s25 + $0x38] sm:$0xff] %vm250_vm0, %v209_v9 }
  0xd3   : > { %v210_v10 = vpop.trf.xlu0 }
  0xd4   : > { %259 = vst.msk [vmem:[%s665_s25 + $0x40] sm:$0xff] %vm250_vm0, %v210_v10 }
  0xd7   : > { %v211_v11 = vpop.trf.xlu0 }
  0xd8   : > { %260 = vst.msk [vmem:[%s665_s25 + $0x48] sm:$0xff] %vm250_vm0, %v211_v11 }
  0xdb   : > { %v212_v12 = vpop.trf.xlu0 }
  0xdc   : > { %261 = vst.msk [vmem:[%s665_s25 + $0x50] sm:$0xff] %vm250_vm0, %v212_v12 }
  0xdf   : > { %v213_v13 = vpop.trf.xlu0 }
  0xe0   : > { %262 = vst.msk [vmem:[%s665_s25 + $0x58] sm:$0xff] %vm250_vm0, %v213_v13 }
  0xe3   : > { %v214_v14 = vpop.trf.xlu0 }
  0xe4   : > { %263 = vst.msk [vmem:[%s665_s25 + $0x60] sm:$0xff] %vm250_vm0, %v214_v14 }
  0xe7   : > { %v215_v15 = vpop.trf.xlu0 }
  0xe8   : > { %264 = vst.msk [vmem:[%s665_s25 + $0x68] sm:$0xff] %vm250_vm0, %v215_v15 }
  0xeb   : > { %v216_v16 = vpop.trf.xlu0 }
  0xec   : > { %265 = vst.msk [vmem:[%s665_s25 + $0x70] sm:$0xff] %vm250_vm0, %v216_v16 }
  0xef   : > { %v217_v17 = vpop.trf.xlu0 }
  0xf0   : > { %266 = vst.msk [vmem:[%s665_s25 + $0x78] sm:$0xff] %vm250_vm0, %v217_v17 }
  0xf3   : > { %v234_v18 = vpop.trf.xlu0 }
  0xf4   : > { %267 = vst.msk [vmem:[%s665_s25 + $0x80] sm:$0xff] %vm250_vm0, %v234_v18 }
  0xf7   : > { %v235_v19 = vpop.trf.xlu0 }
  0xf8   : > { %268 = vst.msk [vmem:[%s665_s25 + $0x88] sm:$0xff] %vm250_vm0, %v235_v19 }
  0xfb   : > { %v236_v20 = vpop.trf.xlu0 }
  0xfc   : > { %269 = vst.msk [vmem:[%s665_s25 + $0x90] sm:$0xff] %vm250_vm0, %v236_v20 }
  0xff   : > { %v237_v21 = vpop.trf.xlu0 }
 0x100   : > { %270 = vst.msk [vmem:[%s665_s25 + $0x98] sm:$0xff] %vm250_vm0, %v237_v21 }
 0x103   : > { %v238_v22 = vpop.trf.xlu0 }
 0x104   : > { %271 = vst.msk [vmem:[%s665_s25 + $0xa0] sm:$0xff] %vm250_vm0, %v238_v22 }
 0x107   : > { %v239_v23 = vpop.trf.xlu0 }
 0x108   : > { %272 = vst.msk [vmem:[%s665_s25 + $0xa8] sm:$0xff] %vm250_vm0, %v239_v23 }
 0x10b   : > { %v240_v24 = vpop.trf.xlu0 }
 0x10c   : > { %273 = vst.msk [vmem:[%s665_s25 + $0xb0] sm:$0xff] %vm250_vm0, %v240_v24 }
 0x10f   : > { %v241_v25 = vpop.trf.xlu0 }
 0x110   : > { %274 = vst.msk [vmem:[%s665_s25 + $0xb8] sm:$0xff] %vm250_vm0, %v241_v25 }
 0x113   : > { %v242_v26 = vpop.trf.xlu0 }
 0x114   : > { %275 = vst.msk [vmem:[%s665_s25 + $0xc0] sm:$0xff] %vm250_vm0, %v242_v26 }
 0x117   : > { %v243_v27 = vpop.trf.xlu0 }
 0x118   : > { %276 = vst.msk [vmem:[%s665_s25 + $0xc8] sm:$0xff] %vm250_vm0, %v243_v27 }
 0x11b   : > { %v244_v28 = vpop.trf.xlu0 }
 0x11c   : > { %277 = vst.msk [vmem:[%s665_s25 + $0xd0] sm:$0xff] %vm250_vm0, %v244_v28 }
 0x11f   : > { %v245_v29 = vpop.trf.xlu0 }
 0x120   : > { %278 = vst.msk [vmem:[%s665_s25 + $0xd8] sm:$0xff] %vm250_vm0, %v245_v29 }
 0x123   : > { %v246_v30 = vpop.trf.xlu0 }
 0x124   : > { %279 = vst.msk [vmem:[%s665_s25 + $0xe0] sm:$0xff] %vm250_vm0, %v246_v30 }
 0x127   : > { %v247_v31 = vpop.trf.xlu0 }
 0x128   : > { %280 = vst.msk [vmem:[%s665_s25 + $0xe8] sm:$0xff] %vm250_vm0, %v247_v31 }
 0x12b   : > { %v248_v32 = vpop.trf.xlu0 }
 0x12c   : > { %281 = vst.msk [vmem:[%s665_s25 + $0xf0] sm:$0xff] %vm250_vm0, %v248_v32 }
 0x12f   : > { %v249_v33 = vpop.trf.xlu0 }
 0x130   : > { %282 = vst.msk [vmem:[%s665_s25 + $0xf8] sm:$0xff] %vm250_vm0, %v249_v33 }
 0x131 PF: > { %s14_s11 = sadd.s32 1, %s545_s11   ;;  %s756_s6 = smov %s529_s7 }
 0x132   : > { %p11_p7 = scmp.ge.s32.totalorder %s14_s11, 4   ;;  %s757_s7 = smov %s533_s8 }
 0x133   : > { %s758_s8 = smov %s607_s18  ;;  %s759_s9 = smov %s541_s10 }
 0x134   : > { %s760_s10 = smov %s762_s13  ;;  %13 = sbr.rel (!%p11_p7) target bundleno = 4 (0x4), region = 64 }
 0x13b   :  { %319 = vsyncpa [#allocation3], 1 }
 0x13c   :  { %321 = vsyncpa [#allocation3 + $0x1], 1 }

</bundles_post_ra>
